<compile_context>
chip_gen: v7x
topology: tpu7x:2x2x1
jax: 0.10.0
libtpu: 0.0.40
codegen_flags: <defaults>
</compile_context>

<pallas_src>
import math
import numpy as np
import jax
import jax.numpy as jnp
from jax import lax
from jax.experimental import pallas as pl
from jax.experimental.pallas import tpu as pltpu

LN2 = math.log(2.0)

# ---------------------------------------------------------------------------
# e3nn normalizes every activation to unit second moment under N(0,1) input
# (normalize2mom).  e3nn estimates the constant by Monte Carlo (1M torch samples,
# seed 0); here the same constant is computed deterministically by quadrature
# (agrees to ~1e-3 relative — parity vs the torch module needs ~2e-3 tolerance).
# ---------------------------------------------------------------------------
def _norm2mom_const(f):
    z = np.linspace(-12.0, 12.0, 480001)
    pdf = np.exp(-0.5 * z * z) / math.sqrt(2.0 * math.pi)
    m2 = float(np.sum((f(z) ** 2) * pdf) * (z[1] - z[0]))
    c = m2 ** -0.5
    return 1.0 if abs(c - 1.0) < 1e-4 else c


def _ssp_np(x):  # ShiftedSoftPlus: softplus(x) - log(2)
    return np.maximum(x, 0.0) + np.log1p(np.exp(-np.abs(x))) - LN2


C_SSP = float(_norm2mom_const(_ssp_np))        # for 0e scalars and 0e gates
C_TANH = float(_norm2mom_const(np.tanh))       # for 0o scalars

# static layout constants
D_IN = 80
D_OUT = 64
D_IN2 = 2 * D_IN      # two original rows packed per kernel row -> 160 input lanes
D_OUT2 = 2 * D_OUT    # packed output row -> 128 lanes (full lane width)


def _ssp(x):
    # shifted softplus, numerically stable form (VPU + EUP exp/log)
    return jnp.maximum(x, 0.0) + jnp.log1p(jnp.exp(-jnp.abs(x))) - LN2


def _round_up(a, b):
    return ((a + b - 1) // b) * b


def _cdiv(a, b):
    return -(-a // b)


# ---------------------------------------------------------------------------
# Kernel.  Each kernel row holds TWO original rows (cols 0:80 = row 2k, cols
# 80:160 = row 2k+1), so the output block is exactly 128 lanes wide and its HBM
# writeback is fully dense.  Inside the block an inner fori_loop walks `ch`-row
# sub-chunks:
#   * ssp / tanh are evaluated once, in place, on the first 128-lane vreg column
#     (covers both halves' scalars + gates without any lane concatenation)
#   * the gate -> gated-component broadcast AND its placement at the output
#     columns is one K=128 MXU matmul against a constant (128,128) 0/C_SSP matrix
#   * results are written with direct sub-slice stores into o_ref (no concats)
# ---------------------------------------------------------------------------
def _make_gate_kernel(ch, n_chunks):
    def gate_kernel(x_ref, o_ref):
        # (128,128) expansion matrix, built once per grid step (outside the
        # chunk loop; cheap iota+compare, no extra input stream / DMA buffer):
        #   row r in [ 8, 24): gate j=r-8   -> output cols 16+3j .. 16+3j+3  (half A)
        #   row r in [88,104): gate j=r-88  -> output cols 80+3j .. 80+3j+3  (half B)
        # nonzero value is C_SSP, folding the normalize2mom gate scale into the MXU.
        r = lax.broadcasted_iota(jnp.int32, (128, 128), 0)
        c = lax.broadcasted_iota(jnp.int32, (128, 128), 1)
        in_a = jnp.logical_and(r >= 8, r < 24)
        in_b = jnp.logical_and(r >= 88, r < 104)
        start = jnp.where(in_b, 80 + 3 * (r - 88), 16 + 3 * (r - 8))
        hit = jnp.logical_and(jnp.logical_or(in_a, in_b),
                              jnp.logical_and(c >= start, c < start + 3))
        expand = jnp.where(hit, jnp.float32(C_SSP), jnp.float32(0.0))

        def body(i, carry):
            off = pl.multiple_of(i * ch, ch)
            rows = pl.ds(off, ch)

            x = x_ref[rows, :].astype(jnp.float32)          # (ch, 160)
            x0 = x[:, 0:128]                                # first 128-lane vreg col

            # one ssp + one tanh pass over that vreg column (in place; unused
            # lanes are simply ignored)
            ssp0 = _ssp(x0)
            th0 = jnp.tanh(x0)

            # scalar outputs — direct sub-slice (masked) stores, no concatenates
            o_ref[rows, 0:8] = (C_SSP * ssp0[:, 0:8]).astype(o_ref.dtype)
            o_ref[rows, 8:16] = (C_TANH * th0[:, 24:32]).astype(o_ref.dtype)
            o_ref[rows, 64:72] = (C_SSP * ssp0[:, 80:88]).astype(o_ref.dtype)
            o_ref[rows, 72:80] = (C_TANH * th0[:, 104:112]).astype(o_ref.dtype)

            # gate extraction + expansion + placement: one K=128 MXU matmul.
            # Only rows 8:24 / 88:104 of `expand` are nonzero, so the non-gate
            # lanes of ssp0 do not contribute.
            g_exp = jnp.dot(ssp0, expand, preferred_element_type=jnp.float32)

            # gated outputs (gate already carries the C_SSP scale)
            o_ref[rows, 16:64] = (x[:, 32:80] * g_exp[:, 16:64]).astype(o_ref.dtype)
            o_ref[rows, 80:128] = (x[:, 112:160] * g_exp[:, 80:128]).astype(o_ref.dtype)
            return carry

        lax.fori_loop(0, n_chunks, body, 0)

    return gate_kernel


def activation_layer_forward(x, *, tile_n=8192, chunk=256):
    """Gate activation forward.  x: [N, 80] float32 -> [N, 64] float32."""
    n, d = x.shape
    assert d == D_IN, f"expected last dim {D_IN}, got {d}"
    assert x.dtype == jnp.float32, "this kernel is specialized to float32 I/O"
    if n == 0:
        return jnp.zeros((0, D_OUT), x.dtype)

    # Pack two consecutive rows per kernel row (row-major reshape, layout-preserving)
    # so the output block is a dense 128-lane write.  Only odd N needs a 1-row pad.
    padded = (n % 2) != 0
    if padded:
        x = jnp.pad(x, ((0, 1), (0, 0)))
    n_even = x.shape[0]
    n_pack = n_even // 2
    x_packed = x.reshape(n_pack, D_IN2)

    # Tile selection: big tiles to amortize the ~0.35us per-grid-step cost, but
    # at least 2 grid steps (v7x has 2 TensorCores), balanced so the ragged last
    # block stays small.  Ragged tails are handled by Pallas boundary masking —
    # no full-array pad / slice round-trips through HBM.
    t2_cap = max(chunk, tile_n // 2)          # max packed rows per block
    if n_pack <= 8:
        t2, num_tiles, ch, n_chunks = n_pack, 1, n_pack, 1
    else:
        num_tiles = max(2, _cdiv(n_pack, t2_cap))
        t2 = _round_up(_cdiv(n_pack, num_tiles), 8)
        if t2 > chunk:
            t2 = _round_up(t2, chunk)
            ch = chunk
        else:
            ch = t2
        n_chunks = t2 // ch
        num_tiles = _cdiv(n_pack, t2)

    out_packed = pl.pallas_call(
        _make_gate_kernel(ch, n_chunks),
        out_shape=jax.ShapeDtypeStruct((n_pack, D_OUT2), x.dtype),
        grid_spec=pl.GridSpec(
            grid=(num_tiles,),
            in_specs=[pl.BlockSpec((t2, D_IN2), lambda i: (i, 0))],
            out_specs=pl.BlockSpec((t2, D_OUT2), lambda i: (i, 0)),
        ),
        compiler_params=pltpu.CompilerParams(
            dimension_semantics=("parallel",),
            vmem_limit_bytes=32 * 1024 * 1024,   # safe on v5e/v6e/v7x; ~10 MiB used
        ),
    )(x_packed)

    out = out_packed.reshape(n_even, D_OUT)
    return out[:n] if padded else out


# pure-JAX reference of the same Gate semantics (for a correctness check)
def gate_reference(x):
    s_e = C_SSP * _ssp(x[:, 0:8])
    s_o = C_TANH * jnp.tanh(x[:, 24:32])
    g = C_SSP * _ssp(x[:, 8:24])
    g_exp = jnp.repeat(g, 3, axis=1)
    return jnp.concatenate([s_e, s_o, x[:, 32:80] * g_exp], axis=1)


if __name__ == "__main__":
    key = jax.random.PRNGKey(0)
    # small node-feature batches; one even N that is NOT a tile multiple (ragged
    # last block) and one odd N (exercises the 1-row-pad path)
    for N in (100, 37):
        k = jax.random.fold_in(key, N)
        x = jax.random.normal(k, (N, D_IN), dtype=jnp.float32)

        out = jax.block_until_ready(activation_layer_forward(x))
        ref = jax.block_until_ready(gate_reference(x))
        np.testing.assert_allclose(np.asarray(out), np.asarray(ref),
                                   rtol=1e-5, atol=1e-5)

    print("KERNEL_OK")
</pallas_src>

<mosaic_0001>
module attributes {stable_mosaic.version = 11 : i64} {
  func.func @gate_kernel(%arg0: i32, %arg1: memref<32x160xf32, #tpu.memory_space<vmem>>, %arg2: memref<32x128xf32, #tpu.memory_space<vmem>>) attributes {dimension_semantics = [#tpu.dimension_semantics<parallel>], iteration_bounds = array<i64: 2>, scalar_prefetch = 0 : i64, scratch_operands = 0 : i64, tpu.core_type = #tpu.core_type<tc>, window_params = [{transform_indices = @transform_0, window_bounds = array<i64: 32, 160>}, {transform_indices = @transform_1, window_bounds = array<i64: 32, 128>}]} {
    %0 = tpu.iota {dimensions = array<i32: 0>} : vector<128x128xi32>
    %1 = tpu.iota {dimensions = array<i32: 1>} : vector<128x128xi32>
    %c8_i32 = arith.constant 8 : i32
    %2 = vector.broadcast %c8_i32 : i32 to vector<128x128xi32>
    %3 = arith.cmpi sge, %0, %2 : vector<128x128xi32>
    %c24_i32 = arith.constant 24 : i32
    %4 = vector.broadcast %c24_i32 : i32 to vector<128x128xi32>
    %5 = arith.cmpi slt, %0, %4 : vector<128x128xi32>
    %6 = arith.andi %3, %5 : vector<128x128xi1>
    %c88_i32 = arith.constant 88 : i32
    %7 = vector.broadcast %c88_i32 : i32 to vector<128x128xi32>
    %8 = arith.cmpi sge, %0, %7 : vector<128x128xi32>
    %c104_i32 = arith.constant 104 : i32
    %9 = vector.broadcast %c104_i32 : i32 to vector<128x128xi32>
    %10 = arith.cmpi slt, %0, %9 : vector<128x128xi32>
    %11 = arith.andi %8, %10 : vector<128x128xi1>
    %c88_i32_0 = arith.constant 88 : i32
    %12 = vector.broadcast %c88_i32_0 : i32 to vector<128x128xi32>
    %13 = arith.subi %0, %12 : vector<128x128xi32>
    %c3_i32 = arith.constant 3 : i32
    %14 = vector.broadcast %c3_i32 : i32 to vector<128x128xi32>
    %15 = arith.muli %14, %13 : vector<128x128xi32>
    %c80_i32 = arith.constant 80 : i32
    %16 = vector.broadcast %c80_i32 : i32 to vector<128x128xi32>
    %17 = arith.addi %16, %15 : vector<128x128xi32>
    %c8_i32_1 = arith.constant 8 : i32
    %18 = vector.broadcast %c8_i32_1 : i32 to vector<128x128xi32>
    %19 = arith.subi %0, %18 : vector<128x128xi32>
    %c3_i32_2 = arith.constant 3 : i32
    %20 = vector.broadcast %c3_i32_2 : i32 to vector<128x128xi32>
    %21 = arith.muli %20, %19 : vector<128x128xi32>
    %c16_i32 = arith.constant 16 : i32
    %22 = vector.broadcast %c16_i32 : i32 to vector<128x128xi32>
    %23 = arith.addi %22, %21 : vector<128x128xi32>
    %24 = arith.select %11, %17, %23 : vector<128x128xi1>, vector<128x128xi32>
    %25 = arith.ori %6, %11 : vector<128x128xi1>
    %26 = arith.cmpi sge, %1, %24 : vector<128x128xi32>
    %c3_i32_3 = arith.constant 3 : i32
    %27 = vector.broadcast %c3_i32_3 : i32 to vector<128x128xi32>
    %28 = arith.addi %24, %27 : vector<128x128xi32>
    %29 = arith.cmpi slt, %1, %28 : vector<128x128xi32>
    %30 = arith.andi %26, %29 : vector<128x128xi1>
    %31 = arith.andi %25, %30 : vector<128x128xi1>
    %cst = arith.constant 1.87559628 : f32
    %cst_4 = arith.constant 0.000000e+00 : f32
    %32 = vector.broadcast %cst : f32 to vector<128x128xf32>
    %33 = vector.broadcast %cst_4 : f32 to vector<128x128xf32>
    %34 = arith.select %31, %32, %33 : vector<128x128xi1>, vector<128x128xf32>
    %c0_i32 = arith.constant 0 : i32
    %c32_i32 = arith.constant 32 : i32
    %35 = arith.muli %c0_i32, %c32_i32 : i32
    %36 = tpu.assume_multiple %35, 32 : i32
    %37 = arith.index_cast %36 : i32 to index
    %c0 = arith.constant 0 : index
    %38 = vector.load %arg1[%37, %c0] : memref<32x160xf32, #tpu.memory_space<vmem>>, vector<32x160xf32>
    %39 = vector.extract_strided_slice %38 {offsets = [0, 0], sizes = [32, 128], strides = [1, 1]} : vector<32x160xf32> to vector<32x128xf32>
    %cst_5 = arith.constant 0.000000e+00 : f32
    %40 = vector.broadcast %cst_5 : f32 to vector<32x128xf32>
    %41 = arith.maximumf %39, %40 : vector<32x128xf32>
    %42 = math.absf %39 : vector<32x128xf32>
    %cst_6 = arith.constant 0.000000e+00 : f32
    %43 = vector.broadcast %cst_6 : f32 to vector<32x128xf32>
    %44 = arith.subf %43, %42 : vector<32x128xf32>
    %45 = math.exp %44 : vector<32x128xf32>
    %46 = math.log1p %45 : vector<32x128xf32>
    %47 = arith.addf %41, %46 : vector<32x128xf32>
    %cst_7 = arith.constant 0.693147182 : f32
    %48 = vector.broadcast %cst_7 : f32 to vector<32x128xf32>
    %49 = arith.subf %47, %48 : vector<32x128xf32>
    %50 = math.tanh %39 : vector<32x128xf32>
    %51 = vector.extract_strided_slice %49 {offsets = [0, 0], sizes = [32, 8], strides = [1, 1]} : vector<32x128xf32> to vector<32x8xf32>
    %cst_8 = arith.constant 1.87559628 : f32
    %52 = vector.broadcast %cst_8 : f32 to vector<32x8xf32>
    %53 = arith.mulf %52, %51 : vector<32x8xf32>
    %54 = arith.index_cast %36 : i32 to index
    %c0_9 = arith.constant 0 : index
    %55 = vector.load %arg2[%54, %c0_9] : memref<32x128xf32, #tpu.memory_space<vmem>>, vector<32x8xf32>
    tpu.vector_store %arg2[%54, %c0_9], %53 {strides = array<i32>} : memref<32x128xf32, #tpu.memory_space<vmem>>, vector<32x8xf32>,
    %56 = vector.extract_strided_slice %50 {offsets = [0, 24], sizes = [32, 8], strides = [1, 1]} : vector<32x128xf32> to vector<32x8xf32>
    %cst_10 = arith.constant 1.5925374 : f32
    %57 = vector.broadcast %cst_10 : f32 to vector<32x8xf32>
    %58 = arith.mulf %57, %56 : vector<32x8xf32>
    %59 = arith.index_cast %36 : i32 to index
    %c8 = arith.constant 8 : index
    %60 = vector.load %arg2[%59, %c8] : memref<32x128xf32, #tpu.memory_space<vmem>>, vector<32x8xf32>
    tpu.vector_store %arg2[%59, %c8], %58 {strides = array<i32>} : memref<32x128xf32, #tpu.memory_space<vmem>>, vector<32x8xf32>,
    %61 = vector.extract_strided_slice %49 {offsets = [0, 80], sizes = [32, 8], strides = [1, 1]} : vector<32x128xf32> to vector<32x8xf32>
    %cst_11 = arith.constant 1.87559628 : f32
    %62 = vector.broadcast %cst_11 : f32 to vector<32x8xf32>
    %63 = arith.mulf %62, %61 : vector<32x8xf32>
    %64 = arith.index_cast %36 : i32 to index
    %c64 = arith.constant 64 : index
    %65 = vector.load %arg2[%64, %c64] : memref<32x128xf32, #tpu.memory_space<vmem>>, vector<32x8xf32>
    tpu.vector_store %arg2[%64, %c64], %63 {strides = array<i32>} : memref<32x128xf32, #tpu.memory_space<vmem>>, vector<32x8xf32>,
    %66 = vector.extract_strided_slice %50 {offsets = [0, 104], sizes = [32, 8], strides = [1, 1]} : vector<32x128xf32> to vector<32x8xf32>
    %cst_12 = arith.constant 1.5925374 : f32
    %67 = vector.broadcast %cst_12 : f32 to vector<32x8xf32>
    %68 = arith.mulf %67, %66 : vector<32x8xf32>
    %69 = arith.index_cast %36 : i32 to index
    %c72 = arith.constant 72 : index
    %70 = vector.load %arg2[%69, %c72] : memref<32x128xf32, #tpu.memory_space<vmem>>, vector<32x8xf32>
    tpu.vector_store %arg2[%69, %c72], %68 {strides = array<i32>} : memref<32x128xf32, #tpu.memory_space<vmem>>, vector<32x8xf32>,
    %cst_13 = arith.constant dense<0.000000e+00> : vector<32x128xf32>
    %71 = tpu.matmul %49, %34, %cst_13 {dimension_numbers = #tpu.dot_dimension_numbers<[1], [0], [0], [1], [0, 0, 1, 1], [], []>} : vector<32x128xf32>, vector<128x128xf32>, vector<32x128xf32> -> vector<32x128xf32>
    %72 = vector.extract_strided_slice %38 {offsets = [0, 32], sizes = [32, 48], strides = [1, 1]} : vector<32x160xf32> to vector<32x48xf32>
    %73 = vector.extract_strided_slice %71 {offsets = [0, 16], sizes = [32, 48], strides = [1, 1]} : vector<32x128xf32> to vector<32x48xf32>
    %74 = arith.mulf %72, %73 : vector<32x48xf32>
    %75 = arith.index_cast %36 : i32 to index
    %c16 = arith.constant 16 : index
    %76 = vector.load %arg2[%75, %c16] : memref<32x128xf32, #tpu.memory_space<vmem>>, vector<32x48xf32>
    tpu.vector_store %arg2[%75, %c16], %74 {strides = array<i32>} : memref<32x128xf32, #tpu.memory_space<vmem>>, vector<32x48xf32>,
    %77 = vector.extract_strided_slice %38 {offsets = [0, 112], sizes = [32, 48], strides = [1, 1]} : vector<32x160xf32> to vector<32x48xf32>
    %78 = vector.extract_strided_slice %71 {offsets = [0, 80], sizes = [32, 48], strides = [1, 1]} : vector<32x128xf32> to vector<32x48xf32>
    %79 = arith.mulf %77, %78 : vector<32x48xf32>
    %80 = arith.index_cast %36 : i32 to index
    %c80 = arith.constant 80 : index
    %81 = vector.load %arg2[%80, %c80] : memref<32x128xf32, #tpu.memory_space<vmem>>, vector<32x48xf32>
    tpu.vector_store %arg2[%80, %c80], %79 {strides = array<i32>} : memref<32x128xf32, #tpu.memory_space<vmem>>, vector<32x48xf32>,
    %c1_i32 = arith.constant 1 : i32
    return
  }
  func.func @transform_0(%arg0: i32) -> (i32, i32) {
    %c0_i32 = arith.constant 0 : i32
    %c0_i32_0 = arith.constant 0 : i32
    return %arg0, %c0_i32 : i32, i32
  }
  func.func @transform_1(%arg0: i32) -> (i32, i32) {
    %c0_i32 = arith.constant 0 : i32
    %c0_i32_0 = arith.constant 0 : i32
    return %arg0, %c0_i32 : i32, i32
  }
}

</mosaic_0001>

<bundles_post_ra>
// kernel: tpu_custom_call.1
= control target key start
LH: loop header
LB: loop body
LE: loop exit
PB: predicated region body
PF: predicated region fallthrough
CT: control target
= control target key end

     0   :  { %6 = vsyncpa [#allocation3], 0  ;;  %s1597_s0 = inlined_call_operand.hbm [shape: f32[50,160], index: 0, kind: input, shape index: {}]   ;;  %s1598_s1 = inlined_call_operand.hbm [shape: f32[50,128], index: 1, kind: output, shape index: {}]  }
   0x1   :  { %8 = vsyncpa [#allocation3 + $0x1], 0 }
   0x2   :  { %9 = vsyncpa [#allocation4], 0 }
   0x3   :  { %11 = vsyncpa [#allocation4 + $0x1], 0  ;;  %s1266_s6 = smov 0   ;;  %s1268_s7 = smov 0  }
   0x4   :  { %s1270_s8 = smov 0   ;;  %s1272_s9 = smov 0  }
   0x5 LB: > { %s1287_s10 = sadd.s32 4294967295, %s1240_s9   ;;  %s918_s11 = sadd.s32 4294967294, %s1240_s9   ;;  %s1240_s9 = sphi %s1272_s9, %s1612_s9   ;;  %s1236_s8 = sphi %s1270_s8, %s1611_s8   ;;  %s1232_s7 = sphi %s1268_s7, %s1610_s7   ;;  %s1228_s6 = sphi %s1266_s6, %s1609_s6  }
   0x6   : > { %s1291_s12 = sadd.s32 1, %s1240_s9   ;;  %s24_s13 = sadd.s32 1, %s1236_s8 }
   0x7   : > { %s21_s14 = ssub.s32 %s1240_s9, %s1291_s12  ;;  %p31_p0 = scmp.ne.s32.totalorder %s1236_s8, %s1232_s7 }
   0x8   : > { %p22_p1 = scmp.eq.s32.totalorder %s21_s14, 0  ;;  %p32_p2 = scmp.eq.s32.totalorder %s1240_s9, 0 }
   0x9   : > { %p37_p3 = scmp.ne.s32.totalorder %s1232_s7, %s1228_s6  ;;  %p38_p4 = scmp.eq.s32.totalorder %s1287_s10, 0 }
   0xa   : > { %s1303_s15 = scalar_select %p22_p1, %s1236_s8, %s24_s13  }
   0xb   : > { %p33_p5 = por %p32_p2, %p31_p0  ;;  %p1305_p6 = por %p38_p4, %p37_p3 }
   0xc   : > { %p61_p7 = scmp.eq.s32.totalorder %s1287_s10, 1  ;;  %p67_p8 = scmp.eq.s32.totalorder %s918_s11, 1 }
   0xd   : > { %p1599_p11 = scmp.ge.s32.totalorder %s1240_s9, 2 }
   0xe   : > { %p1310_p9 = por %p61_p7, %p31_p0  ;;  %p1314_p10 = por %p67_p8, %p37_p3 }
   0xf   : > { %83 = sbr.rel (%p1599_p11) target bundleno = 57 (0x39), region = 16 }
  0x10   : > { %s1602_s18 = scalar_select %p1314_p10, 1, 0 }
  0x16   : > { %86 = sbr.rel (!%p33_p5) target bundleno = 57 (0x39), region = 20  ;;  %s87_s19 = sand.u32 (%p33_p5), 1, %s1236_s8  }
  0x17   : > { %s922_s20 = sshll.u32 (%p33_p5), %s1240_s9, 2  ;;  %s921_s21 = sshll.u32 (%p33_p5), %s87_s19, 6 }
  0x18   : > { %s93_s22 = ssub.s32 (%p33_p5), 7, %s922_s20  ;;  %s1326_s25 = scalar_lea.sflag (%p33_p5), [#allocation3], %s87_s19 }
  0x19   : > { %p94_p12 = scmp.lt.s32.totalorder (%p33_p5), %s93_s22, 4  ;;  %s91_s26 = scalar_lea.vmem (%p33_p5), [#allocation2], %s921_s21 }
  0x1d   : > { %s1614_s22 = smov (!%p94_p12, %s93_s22), 4 }
  0x1e   : > { %s1323_s23 = sshll.u32 %s1614_s22, 8 }
  0x1f   : > { %s99_s24 = ssub.s32 1024, %s1323_s23 }
  0x20   : > { %100 = vsyncadd %s1326_s25, %s99_s24  ;;  %p925_p13 = scmp.ne.s32.totalorder %s1323_s23, 0  ;;  %s982_s27 = sshll.u32 %s1240_s9, 10 }
  0x21   : > { %s1334_s30 = scalar_lea.hbm %s1597_s0, %s982_s27  ;;  %s106_s2 = sshll.u32 %s91_s26, 4  ;;  %s1336_s2 = int_to_ptr.vmem [resolvable:$true] %s106_s2 }
  0x22   : > { %s1146_s3 = scalar_lea.hbm %s1334_s30, %s1323_s23  ;;  %s1150_s11 = scalar_lea.hbm %s1597_s0, 1792 }
  0x23   : > { %p1147_p0 = scmp.ne.s32.totalorder %s1334_s30, %s1146_s3  ;;  %p1151_p3 = scmp.lt.u32.totalorder %s1334_s30, %s1597_s0 }
  0x24   : > { %p1152_p4 = scmp.lt.u32.totalorder %s1150_s11, %s1146_s3  ;;  %p1154_p7 = scmp.lt.u32.totalorder %s1146_s3, %s1334_s30 }
  0x25   : > { %p1148_p1 = pnand %p1147_p0, %p925_p13 }
  0x26   : > { %p1153_p5 = por %p1152_p4, %p1151_p3 }
  0x27   : > { %p1149_p2 = pneg %p1148_p1 }
  0x28   : > { %p1155_p8 = por %p1154_p7, %p1153_p5 }
  0x2a   : > { %p1156_p12 = pnand %p1155_p8, %p1149_p2 }
  0x2c   : > { %1159 = shalt.err (!%p1156_p12)
}
  0x2d   : > { %s1160_s19 = scalar_lea.vmem %s1336_s2, %s1323_s23  ;;  %s1242_s20 = smov [#allocation2]  }
  0x2e   : > { %p1161_p0 = scmp.ne.s32.totalorder %s1336_s2, %s1160_s19  ;;  %s1164_s21 = sshll.u32 %s1242_s20, 4  ;;  %s1165_s21 = int_to_ptr.vmem [resolvable:$false] %s1164_s21 }
  0x2f   : > { %s1166_s22 = scalar_lea.vmem %s1165_s21, 2048  ;;  %p1167_p10 = scmp.lt.s32.totalorder %s1336_s2, %s1165_s21 }
  0x30   : > { %p1162_p1 = pnand %p1161_p0, %p925_p13  ;;  %p1168_p3 = scmp.lt.s32.totalorder %s1166_s22, %s1160_s19 }
  0x32   : > { %p1163_p11 = pneg %p1162_p1  ;;  %p1169_p4 = por %p1168_p3, %p1167_p10 }
  0x34   : > { %p1170_p5 = pnand %p1169_p4, %p1163_p11 }
  0x36   : > { %1173 = shalt.err (!%p1170_p5)
}
  0x37   : > { %s1243_s24 = smov 256   ;;  %s1244_s26 = smov 16  }
  0x38   : > { %112 = dma.hbm_to_vmem [thread:$0]  (%p925_p13), %s1334_s30, %s1323_s23, %s1336_s2, %s1326_s25, %s1243_s24, %s1243_s24, %s1244_s26  }
  0x39 PF: > { %p930_p2 = scmp.ge.s32.totalorder %s1240_s9, 1  ;;  %p114_p7 = scmp.lt.s32.totalorder %s1240_s9, 3 }
  0x3b   : > { %p115_p8 = pnand %p930_p2, %p114_p7 }
  0x3c   : > { %s1366_s27 = sand.u32 (!%p115_p8), 1, %s1232_s7  }
  0x3d   : > { %118 = sbr.rel (%p115_p8) target bundleno = 609 (0x261), region = 24  ;;  %s931_s28 = sshll.u32 (!%p115_p8), %s1366_s27, 6 }
  0x3e   : > { %s121_s29 = scalar_lea.sflag (!%p115_p8), [#allocation3], %s1366_s27  ;;  %s1370_s3 = scalar_lea.vmem (!%p115_p8), [#allocation2], %s931_s28 }
  0x44   : > { %1219 = dma.done.wait (%p1305_p6), %s121_s29, 1024  }
  0x45   : > { %1221 = vsyncadd (%p1305_p6), %s121_s29, 4294966272  ;;  %v154_v0 = vlaneseq  ;;  %v1379_v7 = vld [vmem:[%s1370_s3] sm:$0xff]  ;;  %v1245_v11 = vmov 1.8755963   ;;  %v1246_v12 = vmov 0.0   ;;  %v1390_v16 = vld [vmem:[%s1370_s3 + $0x10] sm:$0xff] }
  0x46   : > { %v1382_v8 = vld [vmem:[%s1370_s3 + $0x20] sm:$0xff]  ;;  %v1386_v13 = vpack.c.bf16 %v1245_v11, %v1246_v12  ;;  %v505_v15 = vand.u32 2147483647, %v1379_v7  ;;  %v1395_v20 = vld [vmem:[%s1370_s3 + $0x30] sm:$0xff]  ;;  %vm1247_vm3 = vmmov 1   ;;  %v1039_v24 = vpack.c.bf16 %v1246_v12, %v1245_v11  ;;  %s932_s16 = sshll.u32 %s1366_s27, 5 }
  0x47   : > { %v155_v1 = vshrl.u32 %v154_v0, 7  ;;  %v1376_v2 = vand.u32 127, %v154_v0  ;;  %v507_v18 = vand.u32 2147483647, %v1382_v8  ;;  %v506_v23 = vand.u32 2147483647, %v1390_v16 }
  0x48   : > { %v509_v19 = vsub.f32 0.0, %v505_v15  ;;  %v508_v30 = vand.u32 2147483647, %v1395_v20  ;;  %v1248_v36 = vmov 0.0|0.0   ;;  %v501_v58 = vmax.f32 %v1379_v7, 0.0  ;;  %s1452_s23 = scalar_lea.vmem [#allocation5], %s932_s16 }
  0x49   : > { %v295_v3 = vmul.u32 3, %v155_v1  ;;  %v157_v4 = vadd.s32 16, %v155_v1  ;;  %v167_v14 = vadd.s32 96, %v155_v1  ;;  %v511_v22 = vsub.f32 0.0, %v507_v18  ;;  %s1249_s25 = smov 16   ;;  %s1250_s30 = smov 32  }
  0x4a   : > { %v513_v27 = vmul.f32 1.442695, %v509_v19  ;;  %v510_v29 = vsub.f32 0.0, %v506_v23  ;;  %v512_v32 = vsub.f32 0.0, %v508_v30  ;;  %v503_v62 = vmax.f32 %v1382_v8, 0.0  ;;  %s1251_s2 = smov 112  }
  0x4b   : > { %v347_v5 = vadd.s32 16, %v295_v3  ;;  %v949_v6 = vadd.s32 4294967288, %v157_v4  ;;  %v311_v25 = vadd.s32 80, %v295_v3  ;;  %v944_v26 = vadd.s32 4294967208, %v167_v14  ;;  %s1252_s4 = smov 96   ;;  %v496_v50 = vld [vmem:[%s1370_s3 + $0x18] sm:$0xff] }
  0x4c   : > { %v517_v28 = vmul.f32 1.442695, %v511_v22  ;;  %1122 = vpow2.f32 %v513_v27  ;;  %v515_v31 = vmul.f32 1.442695, %v510_v29  ;;  %v519_v35 = vmul.f32 1.442695, %v512_v32 }
  0x4d   : > { %vm395_vm0 = vcmp.ge.s32.totalorder %v1376_v2, %v347_v5  ;;  %v411_v9 = vadd.s32 3, %v347_v5  ;;  %v332_v10 = vmul.u32 3, %v949_v6  ;;  %v296_v33 = vmul.u32 3, %v944_v26  ;;  %s826_s5 = scalar_lea.sflag [#allocation4], %s1366_s27  ;;  %s972_s11 = sshll.u32 (%p1310_p9), %s1287_s10, 2 }
  0x4e   : > { %1124 = vpow2.f32 %v517_v28  ;;  %v421_v34 = vadd.s32 3, %v311_v25  ;;  %vm405_vm9 = vcmp.ge.s32.totalorder %v1376_v2, %v311_v25  ;;  %v504_v18 = vmax.f32 %v1395_v20, 0.0  ;;  %s834_s13 = ssub.s32 (%p1310_p9), 7, %s972_s11 }
  0x4f   : > { %vm427_vm1 = vcmp.lt.s32.totalorder %v1376_v2, %v411_v9  ;;  %v348_v17 = vadd.s32 16, %v332_v10  ;;  %1126 = vpow2.f32 %v515_v31  ;;  %v312_v37 = vadd.s32 80, %v296_v33  ;;  %p835_p6 = scmp.lt.s32.totalorder (%p1310_p9), %s834_s13, 4 }
  0x50   : > { %vm443_vm2 = vmand %vm395_vm0, %vm427_vm1  ;;  %1128 = vpow2.f32 %v519_v35  ;;  %vm437_vm10 = vcmp.lt.s32.totalorder %v1376_v2, %v421_v34  ;;  %v502_v10 = vmax.f32 %v1390_v16, 0.0 }
  0x51   : > { %vm1034_vm4 = vmpackc.low %vm443_vm2, %vm1247_vm3  ;;  %vm396_vm5 = vcmp.ge.s32.totalorder %v1376_v2, %v348_v17  ;;  %v412_v21 = vadd.s32 3, %v348_v17  ;;  %v422_v39 = vadd.s32 3, %v312_v37  ;;  %vm406_vm13 = vcmp.ge.s32.totalorder %v1376_v2, %v312_v37 }
  0x52   : > { %1035 = vmatprep.subr.msk.bf16.mxu0 %vm1034_vm4, %v1386_v13  ;;  %1057 = vmatprep.subr.msk.bf16.mxu1 %vm1034_vm4, %v1386_v13  ;;  %vm453_vm11 = vmand %vm405_vm9, %vm437_vm10  ;;  %vm811_vm9 = vcmask 785408   ;;  %vm820_vm10 = vcmask 1048192  }
  0x53   : > { %1038 = vmatpush3.bf16.msk.msra.mxu0 %vm1034_vm4, %v1386_v13  ;;  %1064 = vmatpush3.bf16.msk.msra.mxu1 %vm1034_vm4, %v1386_v13  ;;  %vm428_vm6 = vcmp.lt.s32.totalorder %v1376_v2, %v412_v21  ;;  %vm1413_vm12 = vmpackc.low %vm453_vm11, %vm1247_vm3  ;;  %vm438_vm14 = vcmp.lt.s32.totalorder %v1376_v2, %v422_v39  ;;  %vm573_vm4 = vcmask 64512  }
  0x54   : > { %vm444_vm7 = vmand %vm396_vm5, %vm428_vm6  ;;  %vm598_vm5 = vcmask 130112   ;;  %vm619_vm6 = vcmask 589312  }
  0x55   : > { %vm1040_vm8 = vmpackc.low %vm1247_vm3, %vm444_vm7  ;;  %vm636_vm7 = vcmask 654912  }
  0x56   : > { %1041 = vmatprep.subr.msk.bf16.mxu0 %vm1040_vm8, %v1039_v24  ;;  %1058 = vmatprep.subr.msk.bf16.mxu1 %vm1040_vm8, %v1039_v24  ;;  %v1123_v38 = vpop.eup %1122  ;;  %vm1425_vm15 = vmand %vm406_vm13, %vm438_vm14 }
  0x57   : > { %1044 = vmatpush3.bf16.msk.msra.mxu0 %vm1040_vm8, %v1039_v24  ;;  %1065 = vmatpush3.bf16.msk.msra.mxu1 %vm1040_vm8, %v1039_v24  ;;  %v521_v41 = vadd.f32 1.0, %v1123_v38  ;;  %v524_v45 = vmul.f32 -0.5, %v1123_v38  ;;  %v527_v53 = vand.u32 2147483647, %v1123_v38  ;;  %vm762_vm8 = vcmask 523392  }
  0x58   : > { %1045 = vmatprep.subr.bf16.mxu0 %v1248_v36  ;;  %1059 = vmatprep.subr.bf16.mxu1 %v1248_v36  ;;  %v1125_v40 = vpop.eup %1124 }
  0x59   : > { %v539_v42 = vadd.f32 1.0, %v1125_v40  ;;  %v1127_v43 = vpop.eup %1126  ;;  %1130 = vlog2.f32 %v521_v41  ;;  %v542_v48 = vmul.f32 -0.5, %v1125_v40  ;;  %v525_v52 = vadd.f32 1.0, %v524_v45 }
  0x5a   : > { %v530_v46 = vadd.f32 1.0, %v1127_v43  ;;  %v1129_v47 = vpop.eup %1128  ;;  %v533_v51 = vmul.f32 -0.5, %v1127_v43  ;;  %v545_v56 = vand.u32 2147483647, %v1125_v40  ;;  %v536_v60 = vand.u32 2147483647, %v1127_v43 }
  0x5b   : > { %1046 = vmatpush3.bf16.msra.mxu0 %v1248_v36  ;;  %1066 = vmatpush3.bf16.msra.mxu1 %v1248_v36  ;;  %1132 = vlog2.f32 %v539_v42  ;;  %v548_v49 = vadd.f32 1.0, %v1129_v47  ;;  %v543_v54 = vadd.f32 1.0, %v542_v48  ;;  %v551_v55 = vmul.f32 -0.5, %v1129_v47 }
  0x5c   : > { %1047 = vmatprep.subr.bf16.mxu0 %v1248_v36  ;;  %1060 = vmatprep.subr.bf16.mxu1 %v1248_v36  ;;  %1134 = vlog2.f32 %v530_v46  ;;  %v534_v57 = vadd.f32 1.0, %v533_v51  ;;  %v526_v59 = vmul.f32 %v1123_v38, %v525_v52  ;;  %vm528_vm0 = vcmp.lt.f32.partialorder %v527_v53, 0.0004427343 }
  0x5d   : > { %1136 = vlog2.f32 %v548_v49  ;;  %v544_v63 = vmul.f32 %v1125_v40, %v543_v54  ;;  %v552_v0 = vadd.f32 1.0, %v551_v55  ;;  %vm546_vm1 = vcmp.lt.f32.partialorder %v545_v56, 0.0004427343  ;;  %v494_v56 = vld [vmem:[%s1370_s3 + $0x8] sm:$0xff] }
  0x5e   : > { %v554_v3 = vand.u32 2147483647, %v1129_v47  ;;  %v535_v5 = vmul.f32 %v1127_v43, %v534_v57  ;;  %vm537_vm2 = vcmp.lt.f32.partialorder %v536_v60, 0.0004427343  ;;  %1138 = vtanh.f32 %v1379_v7  ;;  %v498_v60 = vld [vmem:[%s1370_s3 + $0x28] sm:$0xff] }
  0x5f   : > { %1048 = vmatpush3.bf16.msra.mxu0 %v1248_v36  ;;  %1067 = vmatpush3.bf16.msra.mxu1 %v1248_v36  ;;  %v553_v14 = vmul.f32 %v1129_v47, %v552_v0  ;;  %1140 = vtanh.f32 %v1390_v16  ;;  %v500_v0 = vld [vmem:[%s1370_s3 + $0x38] sm:$0xff] }
  0x60   : > { %1049 = vmatprep.subr.bf16.mxu0 %v1248_v36  ;;  %1061 = vmatprep.subr.bf16.mxu1 %v1248_v36  ;;  %vm555_vm3 = vcmp.lt.f32.partialorder %v554_v3, 0.0004427343  ;;  %1142 = vtanh.f32 %v1382_v8 }
  0x61   : > { %1144 = vtanh.f32 %v1395_v20 }
  0x63   : > { %1050 = vmatpush3.bf16.msra.mxu0 %v1248_v36  ;;  %1068 = vmatpush3.bf16.msra.mxu1 %v1248_v36  ;;  %v1131_v61 = vpop.eup %1130 }
  0x64   : > { %1053 = vmatprep.subr.msk.bf16.mxu0 %vm1413_vm12, %v1386_v13  ;;  %1062 = vmatprep.subr.msk.bf16.mxu1 %vm1413_vm12, %v1386_v13  ;;  %v523_v2 = vmul.f32 0.6931472, %v1131_v61 }
  0x65   : > { %v1133_v1 = vpop.eup %1132 }
  0x66   : > { %v541_v4 = vmul.f32 0.6931472, %v1133_v1  ;;  %v1135_v6 = vpop.eup %1134  ;;  %v529_v9 = vsel %vm528_vm0, %v526_v59, %v523_v2 }
  0x67   : > { %1056 = vmatpush3.bf16.msk.msra.mxu0 %vm1413_vm12, %v1386_v13  ;;  %1069 = vmatpush3.bf16.msk.msra.mxu1 %vm1413_vm12, %v1386_v13  ;;  %v557_v12 = vadd.f32 %v529_v9, %v501_v58  ;;  %v1137_v15 = vpop.eup %1136 }
  0x68   : > { %1025 = vmatprep.subr.msk.mxu0 %vm1425_vm15, %v1245_v11  ;;  %1063 = vmatprep.subr.msk.mxu1 %vm1425_vm15, %v1245_v11  ;;  %v547_v13 = vsel %vm546_vm1, %v544_v63, %v541_v4  ;;  %v550_v22 = vmul.f32 0.6931472, %v1137_v15  ;;  %v1139_v37 = vpop.eup %1138 }
  0x69   : > { %v559_v17 = vadd.f32 %v547_v13, %v503_v62  ;;  %v963_v19 = vadd.f32 -0.6931472, %v557_v12  ;;  %v1141_v38 = vpop.eup %1140  ;;  %v578_v39 = vmul.f32 1.5925374, %v1139_v37 }
  0x6a   : > { %v556_v26 = vsel %vm555_vm3, %v553_v14, %v550_v22  ;;  %v1143_v40 = vpop.eup %1142  ;;  %v579_v41 = vmul.f32 1.5925374, %v1141_v38 }
  0x6b   : > { %1026 = vmatpush3.msk.msra.mxu0 %vm1425_vm15, %v1245_v11  ;;  %1070 = vmatpush3.msk.msra.mxu1 %vm1425_vm15, %v1245_v11  ;;  %v532_v11 = vmul.f32 0.6931472, %v1135_v6  ;;  %v965_v23 = vadd.f32 -0.6931472, %v559_v17  ;;  %v569_v25 = vmul.f32 1.8755963, %v963_v19  ;;  %v560_v29 = vadd.f32 %v556_v26, %v504_v18  ;;  %v1145_v42 = vpop.eup %1144 }
  0x6c   : > { %1027 = vmatprep.mubr.f32.mxu0 %v963_v19  ;;  %v580_v43 = vmul.f32 1.5925374, %v1143_v40  ;;  %v581_v44 = vmul.f32 1.5925374, %v1145_v42 }
  0x6d   : > { %v538_v21 = vsel %vm537_vm2, %v535_v5, %v532_v11  ;;  %v571_v27 = vmul.f32 1.8755963, %v965_v23  ;;  %1030 = vmatprep.mubr.f32.mxu1 %v965_v23  ;;  %574 = vst.msk [vmem:[%s1452_s23] sm:$0xff] %vm573_vm4, %v569_v25  ;;  %v966_v30 = vadd.f32 -0.6931472, %v560_v29 }
  0x6e   : > { %v558_v24 = vadd.f32 %v538_v21, %v502_v10 }
  0x6f   : > { %576 = vst.msk [vmem:[%s1452_s23 + $0x10] sm:$0xff] %vm573_vm4, %v571_v27  ;;  %1031 = vmatmul.mubr.f32.vlgmr.msra.gmra.mrb[0].mxu1 %v966_v30  ;;  %v572_v32 = vmul.f32 1.8755963, %v966_v30 }
  0x70   : > { %v964_v28 = vadd.f32 -0.6931472, %v558_v24 }
  0x71   : > { %577 = vst.msk [vmem:[%s1452_s23 + $0x18] sm:$0xff] %vm573_vm4, %v572_v32 }
  0x72   : > { %1028 = vmatmul.mubr.f32.vlgmr.msra.gmra.mrb[0].mxu0 %v964_v28  ;;  %v570_v31 = vmul.f32 1.8755963, %v964_v28 }
  0x74   : > { %575 = vst.msk [vmem:[%s1452_s23 + $0x8] sm:$0xff] %vm573_vm4, %v570_v31 }
 0x142   : > { %v1032_v35 = vpop.f32.mrb[0].mxu1 }
 0x143   : > { %736 = vrot.lane.b32.xlu1 %v1032_v35, %s1249_s25  ;;  %v717_v36 = vpop.f32.mrb[1].mxu1 }
 0x145   : > { %v1029_v33 = vpop.f32.mrb[0].mxu0 }
 0x146   : > { %732 = vrot.lane.b32.xlu0 %v1029_v33, %s1249_s25  ;;  %v707_v34 = vpop.f32.mrb[1].mxu0 }
 0x147   : > { %769 = vrot.lane.b32.xlu1 %v1029_v33, %s1250_s30 }
 0x14a   : > { %730 = vrot.lane.b32.xlu0 %v707_v34, %s1249_s25 }
 0x14b   : > { %734 = vrot.lane.b32.xlu1 %v717_v36, %s1249_s25 }
 0x14e   : > { %767 = vrot.lane.b32.xlu0 %v707_v34, %s1250_s30 }
 0x14f   : > { %773 = vrot.lane.b32.xlu1 %v1032_v35, %s1250_s30 }
 0x152   : > { %771 = vrot.lane.b32.xlu0 %v717_v36, %s1250_s30 }
 0x153   : > { %588 = vrot.lane.b32.xlu1 %v579_v41, %s1251_s2 }
 0x156   : > { %586 = vrot.lane.b32.xlu0 %v578_v39, %s1251_s2 }
 0x157   : > { %592 = vrot.lane.b32.xlu1 %v581_v44, %s1251_s2 }
 0x15a   : > { %590 = vrot.lane.b32.xlu0 %v580_v43, %s1251_s2 }
 0x15b   : > { %609 = vrot.lane.b32.xlu1 %v570_v31, %s1251_s2 }
 0x15e   : > { %607 = vrot.lane.b32.xlu0 %v569_v25, %s1251_s2 }
 0x15f   : > { %613 = vrot.lane.b32.xlu1 %v572_v32, %s1251_s2 }
 0x162   : > { %611 = vrot.lane.b32.xlu0 %v571_v27, %s1251_s2 }
 0x163   : > { %626 = vrot.lane.b32.xlu1 %v579_v41, %s1252_s4 }
 0x166   : > { %624 = vrot.lane.b32.xlu0 %v578_v39, %s1252_s4 }
 0x167   : > { %630 = vrot.lane.b32.xlu1 %v581_v44, %s1252_s4 }
 0x16a   : > { %628 = vrot.lane.b32.xlu0 %v580_v43, %s1252_s4 }
 0x1b5   : > { %v737_v47 = vpop.permute.xlu1 %736 }
 0x1b6   : > { %v745_v49 = vmul.f32 %v737_v47, %v1395_v20 }
 0x1b8   : > { %v733_v45 = vpop.permute.xlu0 %732 }
 0x1b9   : > { %v743_v46 = vmul.f32 %v733_v45, %v1390_v16  ;;  %v770_v51 = vpop.permute.xlu1 %769 }
 0x1ba   : > { %v781_v52 = vmul.f32 %v770_v51, %v1390_v16  ;;  %v782_v54 = vmul.f32 %v770_v51, %v496_v50 }
 0x1bb   : > { %752 = vrot.lane.b32.xlu1 %v743_v46, %s1251_s2 }
 0x1bc   : > { %v731_v48 = vpop.permute.xlu0 %730  ;;  %799 = vrot.lane.b32.xlu0 %v781_v52, %s1252_s4 }
 0x1bd   : > { %v735_v55 = vpop.permute.xlu1 %734  ;;  %v742_v57 = vmul.f32 %v731_v48, %v1379_v7 }
 0x1be   : > { %v744_v61 = vmul.f32 %v735_v55, %v1382_v8 }
 0x1bf   : > { %756 = vrot.lane.b32.xlu1 %v745_v49, %s1251_s2 }
 0x1c0   : > { %v768_v53 = vpop.permute.xlu0 %767  ;;  %750 = vrot.lane.b32.xlu0 %v742_v57, %s1251_s2 }
 0x1c1   : > { %v780_v59 = vmul.f32 %v768_v53, %v494_v56  ;;  %v774_v16 = vpop.permute.xlu1 %773  ;;  %v779_v2 = vmul.f32 %v768_v53, %v1379_v7 }
 0x1c2   : > { %v786_v4 = vmul.f32 %v774_v16, %v500_v0  ;;  %v785_v10 = vmul.f32 %v774_v16, %v1395_v20 }
 0x1c3   : > { %801 = vrot.lane.b32.xlu1 %v782_v54, %s1252_s4 }
 0x1c4   : > { %v772_v58 = vpop.permute.xlu0 %771  ;;  %754 = vrot.lane.b32.xlu0 %v744_v61, %s1251_s2 }
 0x1c5   : > { %v784_v63 = vmul.f32 %v772_v58, %v498_v60  ;;  %v589_v1 = vpop.permute.xlu1 %588  ;;  %v783_v6 = vmul.f32 %v772_v58, %v1382_v8 }
 0x1c6   : > { %600 = vst.msk [vmem:[%s1452_s23 + $0x8] sm:$0xff] %vm598_vm5, %v589_v1 }
 0x1c7   : > { %797 = vrot.lane.b32.xlu1 %v780_v59, %s1252_s4 }
 0x1c8   : > { %v587_v62 = vpop.permute.xlu0 %586  ;;  %795 = vrot.lane.b32.xlu0 %v779_v2, %s1252_s4 }
 0x1c9   : > { %599 = vst.msk [vmem:[%s1452_s23] sm:$0xff] %vm598_vm5, %v587_v62  ;;  %v593_v5 = vpop.permute.xlu1 %592 }
 0x1ca   : > { %602 = vst.msk [vmem:[%s1452_s23 + $0x18] sm:$0xff] %vm598_vm5, %v593_v5 }
 0x1cb   : > { %805 = vrot.lane.b32.xlu1 %v784_v63, %s1252_s4 }
 0x1cc   : > { %v591_v3 = vpop.permute.xlu0 %590  ;;  %803 = vrot.lane.b32.xlu0 %v783_v6, %s1252_s4 }
 0x1cd   : > { %601 = vst.msk [vmem:[%s1452_s23 + $0x10] sm:$0xff] %vm598_vm5, %v591_v3  ;;  %v610_v9 = vpop.permute.xlu1 %609 }
 0x1ce   : > { %621 = vst.msk [vmem:[%s1452_s23 + $0x8] sm:$0xff] %vm619_vm6, %v610_v9 }
 0x1cf   : > { %809 = vrot.lane.b32.xlu1 %v786_v4, %s1252_s4 }
 0x1d0   : > { %v608_v7 = vpop.permute.xlu0 %607  ;;  %807 = vrot.lane.b32.xlu0 %v785_v10, %s1252_s4 }
 0x1d1   : > { %620 = vst.msk [vmem:[%s1452_s23] sm:$0xff] %vm619_vm6, %v608_v7  ;;  %v614_v8 = vpop.permute.xlu1 %613 }
 0x1d2   : > { %623 = vst.msk [vmem:[%s1452_s23 + $0x18] sm:$0xff] %vm619_vm6, %v614_v8 }
 0x1d4   : > { %v612_v12 = vpop.permute.xlu0 %611 }
 0x1d5   : > { %622 = vst.msk [vmem:[%s1452_s23 + $0x10] sm:$0xff] %vm619_vm6, %v612_v12  ;;  %v627_v11 = vpop.permute.xlu1 %626 }
 0x1d6   : > { %638 = vst.msk [vmem:[%s1452_s23 + $0x8] sm:$0xff] %vm636_vm7, %v627_v11 }
 0x1d8   : > { %v625_v13 = vpop.permute.xlu0 %624 }
 0x1d9   : > { %637 = vst.msk [vmem:[%s1452_s23] sm:$0xff] %vm636_vm7, %v625_v13  ;;  %v631_v15 = vpop.permute.xlu1 %630 }
 0x1da   : > { %640 = vst.msk [vmem:[%s1452_s23 + $0x18] sm:$0xff] %vm636_vm7, %v631_v15 }
 0x1dc   : > { %v629_v14 = vpop.permute.xlu0 %628 }
 0x1dd   : > { %639 = vst.msk [vmem:[%s1452_s23 + $0x10] sm:$0xff] %vm636_vm7, %v629_v14 }
 0x22d   : > { %v753_v20 = vpop.permute.xlu1 %752 }
 0x22e   : > { %764 = vst.msk [vmem:[%s1452_s23 + $0x8] sm:$0xff] %vm762_vm8, %v753_v20  ;;  %v800_v18 = vpop.permute.xlu0 %799 }
 0x231   : > { %v757_v17 = vpop.permute.xlu1 %756 }
 0x232   : > { %766 = vst.msk [vmem:[%s1452_s23 + $0x18] sm:$0xff] %vm762_vm8, %v757_v17  ;;  %v751_v22 = vpop.permute.xlu0 %750 }
 0x233   : > { %763 = vst.msk [vmem:[%s1452_s23] sm:$0xff] %vm762_vm8, %v751_v22 }
 0x235   : > { %v802_v19 = vpop.permute.xlu1 %801 }
 0x236   : > { %v813_v21 = vsel %vm811_vm9, %v800_v18, %v802_v19  ;;  %v755_v24 = vpop.permute.xlu0 %754 }
 0x237   : > { %822 = vst.msk [vmem:[%s1452_s23 + $0x8] sm:$0xff] %vm820_vm10, %v813_v21 }
 0x238   : > { %765 = vst.msk [vmem:[%s1452_s23 + $0x10] sm:$0xff] %vm762_vm8, %v755_v24 }
 0x239   : > { %v798_v23 = vpop.permute.xlu1 %797 }
 0x23a   : > { %v796_v25 = vpop.permute.xlu0 %795 }
 0x23b   : > { %v812_v26 = vsel %vm811_vm9, %v796_v25, %v798_v23 }
 0x23c   : > { %821 = vst.msk [vmem:[%s1452_s23] sm:$0xff] %vm820_vm10, %v812_v26 }
 0x23d   : > { %v806_v27 = vpop.permute.xlu1 %805 }
 0x23e   : > { %v804_v28 = vpop.permute.xlu0 %803  ;;  %832 = sbr.rel (!%p1310_p9) target bundleno = 609 (0x261), region = 32 }
 0x23f   : > { %v814_v29 = vsel %vm811_vm9, %v804_v28, %v806_v27 }
 0x240   : > { %823 = vst.msk [vmem:[%s1452_s23 + $0x10] sm:$0xff] %vm820_vm10, %v814_v29 }
 0x241   : > { %v810_v30 = vpop.permute.xlu1 %809 }
 0x242   : > { %v808_v31 = vpop.permute.xlu0 %807 }
 0x243   : > { %v815_v32 = vsel %vm811_vm9, %v808_v31, %v810_v30 }
 0x244   : > { %824 = vst.msk [vmem:[%s1452_s23 + $0x18] sm:$0xff] %vm820_vm10, %v815_v32 }
 0x245   : > { %s1616_s13 = smov (!%p835_p6, %s834_s13), 4 }
 0x246   : > { %s1538_s14 = sshll.u32 %s1616_s13, 7 }
 0x247   : > { %s839_s19 = ssub.s32 512, %s1538_s14 }
 0x248   : > { %840 = vsyncadd %s826_s5, %s839_s19  ;;  %p974_p10 = scmp.ne.s32.totalorder %s1538_s14, 0  ;;  %s983_s17 = sshll.u32 %s1287_s10, 9 }
 0x249   : > { %s1548_s22 = scalar_lea.hbm %s1598_s1, %s983_s17  ;;  %s845_s24 = sshll.u32 %s1452_s23, 4  ;;  %s1551_s24 = int_to_ptr.vmem [resolvable:$true] %s845_s24 }
 0x24a   : > { %s1174_s26 = scalar_lea.vmem %s1551_s24, %s1538_s14  ;;  %s1253_s28 = smov [#allocation5]  }
 0x24b   : > { %p1175_p9 = scmp.ne.s32.totalorder %s1551_s24, %s1174_s26  ;;  %s1178_s29 = sshll.u32 %s1253_s28, 4  ;;  %s1179_s29 = int_to_ptr.vmem [resolvable:$false] %s1178_s29 }
 0x24c   : > { %s1180_s10 = scalar_lea.vmem %s1179_s29, 1024  ;;  %p1181_p12 = scmp.lt.s32.totalorder %s1551_s24, %s1179_s29 }
 0x24d   : > { %p1176_p11 = pnand %p1175_p9, %p974_p10  ;;  %p1182_p0 = scmp.lt.s32.totalorder %s1180_s10, %s1174_s26 }
 0x24f   : > { %p1177_p13 = pneg %p1176_p11  ;;  %p1183_p1 = por %p1182_p0, %p1181_p12 }
 0x251   : > { %p1184_p3 = pnand %p1183_p1, %p1177_p13 }
 0x253   : > { %1187 = shalt.err (!%p1184_p3)
}
 0x254   : > { %s1188_s3 = scalar_lea.hbm %s1548_s22, %s1538_s14  ;;  %s1192_s25 = scalar_lea.hbm %s1598_s1, 896 }
 0x255   : > { %p1189_p4 = scmp.ne.s32.totalorder %s1548_s22, %s1188_s3  ;;  %p1193_p7 = scmp.lt.u32.totalorder %s1548_s22, %s1598_s1 }
 0x256   : > { %p1194_p8 = scmp.lt.u32.totalorder %s1192_s25, %s1188_s3  ;;  %p1196_p9 = scmp.lt.u32.totalorder %s1188_s3, %s1548_s22 }
 0x257   : > { %p1190_p5 = pnand %p1189_p4, %p974_p10 }
 0x258   : > { %p1195_p6 = por %p1194_p8, %p1193_p7 }
 0x259   : > { %p1191_p2 = pneg %p1190_p5 }
 0x25a   : > { %p1197_p11 = por %p1196_p9, %p1195_p6 }
 0x25c   : > { %p1198_p13 = pnand %p1197_p11, %p1191_p2 }
 0x25e   : > { %1201 = shalt.err (!%p1198_p13)
}
 0x25f   : > { %s1254_s4 = smov 128   ;;  %s1255_s11 = smov 8  }
 0x260   : > { %851 = dma.vmem_to_hbm [thread:$0]  (%p974_p10), %s1551_s24, %s1538_s14, %s1548_s22, %s826_s5, %s1254_s4, %s1254_s4, %s1255_s11  }
 0x261 PF: > { %s860_s13 = sand.u32 1, %s1228_s6   ;;  %p1607_p12 = scmp.ne.s32.totalorder %s1602_s18, 0 }
 0x262   : > { %p1608_p0 = scmp.ge.s32.totalorder %s1240_s9, 2  ;;  %s861_s19 = scalar_lea.sflag [#allocation4], %s860_s13 }
 0x264   : > { %p1074_p1 = pnand %p1608_p0, %p1607_p12 }
 0x266   : > { %1223 = dma.done.wait (!%p1074_p1), %s861_s19, 512  }
 0x267   : > { %1225 = vsyncadd (!%p1074_p1), %s861_s19, 4294966784  ;;  %p14_p3 = scmp.ge.s32.totalorder %s1291_s12, 4   ;;  %s1609_s6 = smov %s1232_s7 }
 0x268   : > { %s1610_s7 = smov %s1236_s8  ;;  %s1611_s8 = smov %s1303_s15 }
 0x269   : > { %s1612_s9 = smov %s1291_s12  ;;  %16 = sbr.rel (!%p14_p3) target bundleno = 5 (0x5), region = 70 }
 0x270   :  { %866 = vsyncpa [#allocation3], 1 }
 0x271   :  { %868 = vsyncpa [#allocation3 + $0x1], 1 }
 0x272   :  { %869 = vsyncpa [#allocation4], 1 }
 0x273   :  { %871 = vsyncpa [#allocation4 + $0x1], 1 }

</bundles_post_ra>
